<compile_context>
chip_gen: v5e
topology: v5e:2x2
jax: 0.10.0
libtpu: 0.0.40
codegen_flags: <defaults>
</compile_context>

<pallas_src>
import jax
import jax.numpy as jnp
from jax.experimental import pallas as pl
from jax.experimental.pallas import tpu as pltpu

SIGMA_DATA = 0.5


def _edm2vp_kernel(wblk_ref, b_ref, ax_ref, bf_ref, x_ref, o_ref):
    """Fused EDM2VP forward on one (row-tile, HW-tile) block.

    wblk_ref : (TR, TR)  VMEM -- block-diagonal channel-mix weights with the
                                 per-batch input scale (c_in / sqrt(ab)) folded in
    b_ref    : (TR, 1)   VMEM -- per-row bias (unet bias tiled over batches)
    ax_ref   : (TR, 1)   VMEM -- per-row coeff on x        (1 - c_skip) / r
    bf_ref   : (TR, 1)   VMEM -- per-row coeff on tanh(f)  -s * c_out / r
    x_ref    : (TR, TH)  VMEM -- VP-space noisy input (lane/sublane dense)
    o_ref    : (TR, TH)  VMEM -- VP epsilon prediction (lane-dense store)
    """
    x = x_ref[...].astype(jnp.float32)

    # Full-width channel mix in one contraction (scale_in already folded into
    # the weights in the wrapper).  HIGHEST precision keeps f32 accuracy.
    f = jnp.dot(wblk_ref[...].astype(jnp.float32), x,
                preferred_element_type=jnp.float32,
                precision=jax.lax.Precision.HIGHEST) + b_ref[...]

    # eps = A*x + B*tanh(f); all per-batch scalar algebra hoisted to wrapper.
    eps = ax_ref[...] * x + bf_ref[...] * jnp.tanh(f)
    o_ref[...] = eps.astype(o_ref.dtype)


def edm2vp_forward(x, t, beta, w, b, *, tile_hw=None, stream_dtype=jnp.float32):
    """JAX/Pallas equivalent of EDM2VP.forward.

    x    : (N, C, H, W) float32   (NCHW, like PyTorch)
    t    : (N,) integer timesteps
    beta : (T,) float32 noise schedule
    w, b : synthetic unet params, (C, C) and (C,)
    """
    N, C, H, W_ = x.shape
    HW = H * W_
    R = N * C

    # --- O(N) scalar metadata (free for XLA to fuse; legal hoisting) ---
    alpha_bar = jnp.cumprod(1.0 - beta.astype(jnp.float32))
    ab_t = alpha_bar[t.astype(jnp.int32)]                 # (N,)
    s = jnp.sqrt(ab_t)                                    # sqrt(alpha_bar[t])
    r = jnp.sqrt(1.0 - ab_t)                              # sqrt(1-alpha_bar[t])
    sigma = r / s
    denom = sigma * sigma + SIGMA_DATA * SIGMA_DATA
    c_skip = (SIGMA_DATA * SIGMA_DATA) / denom
    c_out = sigma * SIGMA_DATA / jnp.sqrt(denom)
    c_in = 1.0 / jnp.sqrt(denom)

    # Fold the wrapper algebra so the kernel only does multiply-adds:
    #   eps = (x - s*x0)/r,  x0 = c_skip*(x/s) + c_out*tanh(W@(c_in*(x/s)) + b)
    #       = [(1-c_skip)/r]*x + [-s*c_out/r]*tanh((scale_in*W)@x + b)
    scale_in = c_in / s                                   # per batch -> into W
    coef_x = (1.0 - c_skip) / r                           # per batch
    coef_f = -(s * c_out) / r                             # per batch

    # Block-diagonal weight with scale_in folded in:
    #   W_blk[n*C+o, m*C+c] = (n == m) * scale_in[n] * w[o, c]
    w_scaled = w.astype(jnp.float32)[None, :, :] * scale_in[:, None, None]  # (N,C,C)
    w_blk = (jnp.eye(N, dtype=jnp.float32)[:, None, :, None]
             * w_scaled[:, :, None, :]).reshape(R, R).astype(stream_dtype)

    def per_row_col(v):  # per-batch scalar -> (R, 1) per-row VMEM column
        return jnp.repeat(v.astype(jnp.float32), C).reshape(R, 1)

    b_col = jnp.tile(b.astype(jnp.float32), N).reshape(R, 1)
    ax_col = per_row_col(coef_x)
    bf_col = per_row_col(coef_f)

    x_flat = x.reshape(R, HW).astype(stream_dtype)

    # --- tiling ---------------------------------------------------------
    # Row tile covers whole batch blocks (multiple of C and of 8); HW tile is
    # a multiple of 128 (lane-dense stores).  At the demo shape: (8, 256),
    # grid (1, 1).  For realistic shapes keep the double-buffered footprint
    # under ~24-28 MiB (v7x: 64 MiB physical / 32 MiB scoped VMEM).
    tile_rows = R
    if tile_hw is None:
        tile_hw = HW if HW <= 2048 else 2048
    assert HW % tile_hw == 0 and tile_hw % 128 == 0
    grid = (R // tile_rows, HW // tile_hw)

    itemsize = jnp.dtype(stream_dtype).itemsize
    cost = pl.CostEstimate(
        flops=(2 * C + 4) * R * HW,
        transcendentals=R * HW,
        bytes_accessed=2 * R * HW * itemsize + R * R * itemsize + 3 * R * 4,
    )

    out = pl.pallas_call(
        _edm2vp_kernel,
        out_shape=jax.ShapeDtypeStruct((R, HW), stream_dtype),
        grid=grid,
        in_specs=[
            pl.BlockSpec((tile_rows, tile_rows), lambda i, j: (i, i)),  # W_blk diag block
            pl.BlockSpec((tile_rows, 1), lambda i, j: (i, 0)),          # bias col
            pl.BlockSpec((tile_rows, 1), lambda i, j: (i, 0)),          # coef_x col
            pl.BlockSpec((tile_rows, 1), lambda i, j: (i, 0)),          # coef_f col
            pl.BlockSpec((tile_rows, tile_hw), lambda i, j: (i, j)),    # x slab
        ],
        out_specs=pl.BlockSpec((tile_rows, tile_hw), lambda i, j: (i, j)),
        compiler_params=pltpu.CompilerParams(
            dimension_semantics=("parallel", "parallel")),
        cost_estimate=cost,
    )(w_blk, b_col, ax_col, bf_col, x_flat)

    return out.reshape(N, C, H, W_).astype(jnp.float32)


def reference_forward(x, t, beta, w, b):
    """Pure-JAX reference mirroring the PyTorch module (for sanity check)."""
    alpha_bar = jnp.cumprod(1.0 - beta.astype(jnp.float32))
    ab_t = alpha_bar[t.astype(jnp.int32)]
    s = jnp.sqrt(ab_t).reshape(-1, 1, 1, 1)
    r = jnp.sqrt(1.0 - ab_t).reshape(-1, 1, 1, 1)
    sigma = r / s

    x_edm = x / s
    denom = sigma * sigma + SIGMA_DATA * SIGMA_DATA
    c_skip = SIGMA_DATA * SIGMA_DATA / denom
    c_out = sigma * SIGMA_DATA / jnp.sqrt(denom)
    c_in = 1.0 / jnp.sqrt(denom)
    f = jnp.einsum("oc,nchw->nohw", w, c_in * x_edm,
                   precision=jax.lax.Precision.HIGHEST) + b.reshape(1, -1, 1, 1)
    x0 = c_skip * x_edm + c_out * jnp.tanh(f)
    return (x - s * x0) / r


if __name__ == "__main__":
    key = jax.random.PRNGKey(0)
    kx, kw, kb = jax.random.split(key, 3)

    N, C, H, W = 2, 4, 16, 16
    T = 1000

    x = jax.random.normal(kx, (N, C, H, W), dtype=jnp.float32)
    t = jnp.array([100, 500], dtype=jnp.int32)
    beta = jnp.linspace(0.1 / 1000, 20 / 1000, T, dtype=jnp.float32)

    # Deterministic synthetic "edm_unet" parameters (1x1 conv).
    # TODO(synk): the real edm_unet is an arbitrary nn.Module; only the EDM
    # preconditioning / VP conversion algebra is translated exactly.
    w_unet = 0.1 * jax.random.normal(kw, (C, C), dtype=jnp.float32)
    b_unet = 0.05 * jax.random.normal(kb, (C,), dtype=jnp.float32)

    eps = edm2vp_forward(x, t, beta, w_unet, b_unet)
    eps = jax.block_until_ready(eps)

    ref = reference_forward(x, t, beta, w_unet, b_unet)
    assert eps.shape == (N, C, H, W)
    assert jnp.allclose(eps, ref, atol=1e-4, rtol=1e-4), "mismatch vs reference"

    print("KERNEL_OK")
</pallas_src>

<mosaic_0001>
module attributes {stable_mosaic.version = 11 : i64} {
  func.func @_edm2vp_kernel(%arg0: i32, %arg1: i32, %arg2: memref<8x8xf32, #tpu.memory_space<vmem>>, %arg3: memref<8x1xf32, #tpu.memory_space<vmem>>, %arg4: memref<8x1xf32, #tpu.memory_space<vmem>>, %arg5: memref<8x1xf32, #tpu.memory_space<vmem>>, %arg6: memref<8x256xf32, #tpu.memory_space<vmem>>, %arg7: memref<8x256xf32, #tpu.memory_space<vmem>>) attributes {dimension_semantics = [#tpu.dimension_semantics<parallel>, #tpu.dimension_semantics<parallel>], iteration_bounds = array<i64: 1, 1>, scalar_prefetch = 0 : i64, scratch_operands = 0 : i64, tpu.core_type = #tpu.core_type<tc>, window_params = [{transform_indices = @transform_0, window_bounds = array<i64: 8, 8>}, {transform_indices = @transform_1, window_bounds = array<i64: 8, 1>}, {transform_indices = @transform_2, window_bounds = array<i64: 8, 1>}, {transform_indices = @transform_3, window_bounds = array<i64: 8, 1>}, {transform_indices = @transform_4, window_bounds = array<i64: 8, 256>}, {transform_indices = @transform_5, window_bounds = array<i64: 8, 256>}]} {
    %c0 = arith.constant 0 : index
    %c0_0 = arith.constant 0 : index
    %0 = vector.load %arg6[%c0, %c0_0] : memref<8x256xf32, #tpu.memory_space<vmem>>, vector<8x256xf32>
    %c0_1 = arith.constant 0 : index
    %c0_2 = arith.constant 0 : index
    %1 = vector.load %arg2[%c0_1, %c0_2] : memref<8x8xf32, #tpu.memory_space<vmem>>, vector<8x8xf32>
    %cst = arith.constant dense<0.000000e+00> : vector<8x256xf32>
    %2 = tpu.matmul %1, %0, %cst {dimension_numbers = #tpu.dot_dimension_numbers<[1], [0], [0], [1], [0, 0, 1, 1], [], []>, precision = #tpu.contract_precision<fp32>} : vector<8x8xf32>, vector<8x256xf32>, vector<8x256xf32> -> vector<8x256xf32>
    %c0_3 = arith.constant 0 : index
    %c0_4 = arith.constant 0 : index
    %3 = vector.load %arg3[%c0_3, %c0_4] : memref<8x1xf32, #tpu.memory_space<vmem>>, vector<8x1xf32>
    %4 = vector.broadcast %3 : vector<8x1xf32> to vector<8x256xf32>
    %5 = arith.addf %2, %4 : vector<8x256xf32>
    %c0_5 = arith.constant 0 : index
    %c0_6 = arith.constant 0 : index
    %6 = vector.load %arg4[%c0_5, %c0_6] : memref<8x1xf32, #tpu.memory_space<vmem>>, vector<8x1xf32>
    %7 = vector.broadcast %6 : vector<8x1xf32> to vector<8x256xf32>
    %8 = arith.mulf %7, %0 : vector<8x256xf32>
    %c0_7 = arith.constant 0 : index
    %c0_8 = arith.constant 0 : index
    %9 = vector.load %arg5[%c0_7, %c0_8] : memref<8x1xf32, #tpu.memory_space<vmem>>, vector<8x1xf32>
    %10 = math.tanh %5 : vector<8x256xf32>
    %11 = vector.broadcast %9 : vector<8x1xf32> to vector<8x256xf32>
    %12 = arith.mulf %11, %10 : vector<8x256xf32>
    %13 = arith.addf %8, %12 : vector<8x256xf32>
    %c0_9 = arith.constant 0 : index
    %c0_10 = arith.constant 0 : index
    %14 = vector.load %arg7[%c0_9, %c0_10] : memref<8x256xf32, #tpu.memory_space<vmem>>, vector<8x256xf32>
    tpu.vector_store %arg7[%c0_9, %c0_10], %13 {strides = array<i32>} : memref<8x256xf32, #tpu.memory_space<vmem>>, vector<8x256xf32>,
    return
  }
  func.func @transform_0(%arg0: i32, %arg1: i32) -> (i32, i32) {
    %c0_i32 = arith.constant 0 : i32
    return %arg0, %arg0 : i32, i32
  }
  func.func @transform_1(%arg0: i32, %arg1: i32) -> (i32, i32) {
    %c0_i32 = arith.constant 0 : i32
    %c0_i32_0 = arith.constant 0 : i32
    return %arg0, %c0_i32 : i32, i32
  }
  func.func @transform_2(%arg0: i32, %arg1: i32) -> (i32, i32) {
    %c0_i32 = arith.constant 0 : i32
    %c0_i32_0 = arith.constant 0 : i32
    return %arg0, %c0_i32 : i32, i32
  }
  func.func @transform_3(%arg0: i32, %arg1: i32) -> (i32, i32) {
    %c0_i32 = arith.constant 0 : i32
    %c0_i32_0 = arith.constant 0 : i32
    return %arg0, %c0_i32 : i32, i32
  }
  func.func @transform_4(%arg0: i32, %arg1: i32) -> (i32, i32) {
    %c0_i32 = arith.constant 0 : i32
    return %arg0, %arg1 : i32, i32
  }
  func.func @transform_5(%arg0: i32, %arg1: i32) -> (i32, i32) {
    %c0_i32 = arith.constant 0 : i32
    return %arg0, %arg1 : i32, i32
  }
}

</mosaic_0001>

<bundles_post_ra>
// kernel: tpu_custom_call.1
= control target key start
LH: loop header
LB: loop body
LE: loop exit
PB: predicated region body
PF: predicated region fallthrough
CT: control target
= control target key end

     0   :  { %vm30_vm0 = vcmask 64512   ;;  %v398_v6 = vmov 0   ;;  %s461_s0 = inlined_call_operand.vmem [shape: f32[8,8], index: 0, kind: input, shape index: {}]   ;;  %s462_s1 = inlined_call_operand.vmem [shape: f32[8,1], index: 1, kind: input, shape index: {}]   ;;  %s463_s2 = inlined_call_operand.vmem [shape: f32[8,1], index: 2, kind: input, shape index: {}]   ;;  %s464_s3 = inlined_call_operand.vmem [shape: f32[8,1], index: 3, kind: input, shape index: {}]   ;;  %s465_s4 = inlined_call_operand.vmem [shape: f32[8,256], index: 4, kind: input, shape index: {}]   ;;  %s466_s5 = inlined_call_operand.hbm [shape: f32[8,256], index: 5, kind: output, shape index: {}]  }
   0x1   :  { %v433_v0 = vld [vmem:[%s465_s4] sm:$0xff]  ;;  %v441_v2 = vld [vmem:[%s465_s4 + $0x8] sm:$0xff]  ;;  %366 = vset.pattern.permute.xlu0 %v398_v6  ;;  %367 = vset.pattern.permute.xlu1 %v398_v6 }
   0x2   :  { %v23_v1 = vld [vmem:[%s461_s0] sm:$0xff]  ;;  %v49_v3 = vand.u32 4294901760, %v433_v0  ;;  %v195_v5 = vand.u32 4294901760, %v441_v2 }
   0x3   :  { %v32_v4 = vsel %vm30_vm0, %v23_v1, 0  ;;  %v24_v7 = vld [vmem:[%s462_s1] sm:$0xff] }
   0x4   :  { %v334_v8 = vld [vmem:[%s464_s3] sm:$0xff]  ;;  %v51_v9 = vand.u32 4294901760, %v32_v4  ;;  %27 = vperm.xlu0 %366, %v24_v7  }
   0x5   :  { %339 = vperm.xlu1 %367, %v334_v8  }
   0x6   :  { %10 = vsyncpa [#allocation3], 0  ;;  %v76_v10 = vsub.f32 %v433_v0, %v49_v3  ;;  %50 = vmatpush.msra.mxu0 %v49_v3  ;;  %126 = vmatpush.msra.mxu3 %v49_v3  ;;  %v222_v11 = vsub.f32 %v441_v2, %v195_v5  ;;  %v52_v12 = vsub.f32 %v32_v4, %v51_v9  ;;  %v326_v18 = vld [vmem:[%s463_s2] sm:$0xff]  ;;  %s399_s2 = smov [#allocation2]   ;;  %s355_s29 = sshll.u32 %s466_s5, 4  ;;  %s356_s29 = int_to_ptr.hbm [resolvable:$true] %s355_s29 }
   0x7   :  { %s353_s4 = sshll.u32 %s399_s2, 4  ;;  %s354_s4 = int_to_ptr.vmem [resolvable:$true] %s353_s4 }
   0x8   :  { %103 = vmatpush.msra.mxu2 %v76_v10  ;;  %v77_v13 = vand.u32 4294901760, %v76_v10  ;;  %v223_v14 = vand.u32 4294901760, %v222_v11  ;;  %v53_v15 = vand.u32 4294901760, %v52_v12 }
   0x9   :  { %106 = vmatmul.f32.vlgmr.msra.gmra.mxu2 %v52_v12 }
   0xa   :  { %196 = vmatpush.msrb.mxu2 %v195_v5  ;;  %152 = vmatpush.msrb.mxu0 %v77_v13  ;;  %v224_v16 = vsub.f32 %v222_v11, %v223_v14  ;;  %v78_v17 = vsub.f32 %v76_v10, %v77_v13  ;;  %v54_v19 = vsub.f32 %v52_v12, %v53_v15 }
   0xb   :  { %130 = vmatmul.f32.vlgmr.msra.gmra.mxu3 %v53_v15 }
   0xc   :  { %298 = vmatpush.msra.mxu2 %v223_v14  ;;  %v225_v20 = vand.u32 4294901760, %v224_v16  ;;  %v79_v21 = vand.u32 4294901760, %v78_v17  ;;  %v55_v22 = vand.u32 4294901760, %v54_v19  ;;  %329 = vperm.xlu0 %366, %v326_v18  }
   0xe   :  { %226 = vmatpush.msrb.mxu3 %v225_v20  ;;  %80 = vmatpush.msra.mxu1 %v79_v21 }
   0xf   :  { %56 = vmatmul.f32.vlgmr.msra.gmra.mxu0 %v55_v22  ;;  %82 = vmatmul.f32.vlgmr.msra.gmra.mxu1 %v51_v9 }
  0x10   :  { %174 = vmatpush.msrb.mxu1 %v49_v3  ;;  %249 = vmatpush.msra.mxu0 %v222_v11 }
  0x11   :  { %202 = vmatmul.f32.vlgmr.msrb.gmra.mxu2 %v55_v22  ;;  %320 = vmatpush.msra.mxu3 %v195_v5 }
  0x12   :  { %272 = vmatpush.msra.mxu1 %v195_v5 }
  0x13   :  { %228 = vmatmul.f32.vlgmr.msrb.gmra.mxu3 %v51_v9 }
  0x17   :  { %154 = vmatmul.f32.vlgmr.msrb.gmra.mxu0 %v51_v9  ;;  %176 = vmatmul.f32.vlgmr.msrb.gmra.mxu1 %v51_v9 }
  0x19   :  { %300 = vmatmul.f32.vlgmr.msra.gmra.mxu2 %v51_v9 }
  0x1b   :  { %322 = vmatmul.f32.vlgmr.msra.gmra.mxu3 %v51_v9 }
  0x1f   :  { %252 = vmatmul.f32.vlgmr.msra.gmra.mxu0 %v52_v12  ;;  %276 = vmatmul.f32.vlgmr.msra.gmra.mxu1 %v53_v15 }
  0x76   :  { %v28_v23 = vpop.permute.xlu0 %27 }
  0x77   :  { %v340_v44 = vpop.permute.xlu1 %339 }
  0x7e   :  { %v330_v42 = vpop.permute.xlu0 %329 }
  0x7f   :  { %v332_v48 = vmul.f32 %v330_v42, %v433_v0  ;;  %v333_v55 = vmul.f32 %v330_v42, %v441_v2 }
  0x8c   :  { %v57_v24 = vpop.f32.mrf.mxu0  ;;  %v83_v25 = vpop.f32.mrf.mxu1 }
  0x8d   :  { %v58_v26 = vadd.f32 %v57_v24, %v28_v23  ;;  %v107_v27 = vpop.f32.mrf.mxu2 }
  0x8e   :  { %v131_v28 = vpop.f32.mrf.mxu3 }
  0x8f   :  { %v84_v29 = vadd.f32 %v83_v25, %v58_v26 }
  0x91   :  { %v108_v30 = vadd.f32 %v107_v27, %v84_v29 }
  0x93   :  { %v132_v31 = vadd.f32 %v131_v28, %v108_v30 }
  0x94   :  { %v155_v32 = vpop.f32.mrf.mxu0  ;;  %v177_v33 = vpop.f32.mrf.mxu1 }
  0x95   :  { %v156_v34 = vadd.f32 %v155_v32, %v132_v31  ;;  %v203_v35 = vpop.f32.mrf.mxu2 }
  0x96   :  { %v204_v36 = vadd.f32 %v203_v35, %v28_v23  ;;  %v229_v37 = vpop.f32.mrf.mxu3 }
  0x97   :  { %v178_v38 = vadd.f32 %v177_v33, %v156_v34 }
  0x98   :  { %v230_v39 = vadd.f32 %v229_v37, %v204_v36 }
  0x99   :  { %368 = vtanh.f32 %v178_v38 }
  0x9c   :  { %v253_v40 = vpop.f32.mrf.mxu0  ;;  %v277_v41 = vpop.f32.mrf.mxu1 }
  0x9d   :  { %v254_v43 = vadd.f32 %v253_v40, %v230_v39  ;;  %v301_v45 = vpop.f32.mrf.mxu2 }
  0x9e   :  { %v323_v50 = vpop.f32.mrf.mxu3 }
  0x9f   :  { %v369_v46 = vpop.eup %368  ;;  %v278_v47 = vadd.f32 %v277_v41, %v254_v43 }
  0xa0   :  { %v342_v49 = vmul.f32 %v369_v46, %v340_v44 }
  0xa1   :  { %v302_v51 = vadd.f32 %v301_v45, %v278_v47 }
  0xa2   :  { %v344_v52 = vadd.f32 %v342_v49, %v332_v48 }
  0xa3   :  { %v324_v53 = vadd.f32 %v323_v50, %v302_v51 }
  0xa4   :  { %346 = vst [vmem:[#allocation2] sm:$0xff] %v344_v52 }
  0xa5   :  { %370 = vtanh.f32 %v324_v53 }
  0xab   :  { %v371_v54 = vpop.eup %370 }
  0xac   :  { %v343_v56 = vmul.f32 %v371_v54, %v340_v44 }
  0xae   :  { %v345_v57 = vadd.f32 %v343_v56, %v333_v55 }
  0xb0   :  { %347 = vst [vmem:[#allocation2 + $0x8] sm:$0xff] %v345_v57 }
  0xb1   :  { %358 = dma.vmem_to_hbm [thread:$0]  %s354_s4, 256, %s356_s29, [#allocation3]  }
  0xb2   :  { %396 = dma.done.wait [#allocation3], 256  }
  0xb3   :  { %397 = vsyncadd [#allocation3], 4294967040 }
  0xb4   :  { %363 = vsyncpa [#allocation3], 1 }

</bundles_post_ra>
